<compile_context>
chip_gen: v7x
topology: tpu7x:2x2x1
jax: 0.10.0
libtpu: 0.0.40
codegen_flags: <defaults>
</compile_context>

<pallas_src>
import functools

import jax
import jax.numpy as jnp
from jax.experimental import pallas as pl
from jax.experimental.pallas import tpu as pltpu


# ---------------------------------------------------------------------------
# Tunables / helpers
# ---------------------------------------------------------------------------
_TM_CAP = 256                      # token-dim tile cap
_TN_CAP = 256                      # output-dim tile cap (fallback path)
_TK_CAP = 512                      # reduction-dim tile cap (fallback path)
_FUSED_WEIGHT_BUDGET = 20 * 1024 * 1024   # resident-weight budget for fused path
_VMEM_LIMIT_CAP = 48 * 1024 * 1024        # never request more scoped VMEM than this
_VMEM_DEFAULT_SAFE = 16 * 1024 * 1024     # v5e scoped default (most restrictive)


def _round_up(n, m):
    return ((n + m - 1) // m) * m


def _pick_tm(M):
    """Token-dim tile: multiple of 16 (bf16-safe sublane packing), <= _TM_CAP,
    preferring >= 2 blocks so megacore / dual-TC chips both get work."""
    Mq = _round_up(M, 16)
    if Mq <= 16:
        return 16
    if Mq <= 2 * _TM_CAP:
        return _round_up(Mq, 32) // 2      # exactly 2 blocks
    return _TM_CAP


def _largest_div(d, cap, quantum):
    """Largest multiple of `quantum` <= cap dividing d (fallback tiling)."""
    t = cap - cap % quantum
    while t >= quantum:
        if d % t == 0:
            return t
        t -= quantum
    raise ValueError(
        f"dim {d} must be a multiple of {quantum} when larger than {cap}")


def _vmem_limit_from_estimate(est_bytes):
    if est_bytes <= _VMEM_DEFAULT_SAFE:
        return None                         # every generation's default is enough
    return min(int(est_bytes), _VMEM_LIMIT_CAP)


# ---------------------------------------------------------------------------
# Kernels
# ---------------------------------------------------------------------------
def _fused_fwd_kernel(x_ref, w1_ref, *rest, num_res, compute_dtype):
    """Whole DimReduction forward for one token tile.

    rest = (wa_0, wb_0, ..., wa_{num_res-1}, wb_{num_res-1}, o_ref).
    All weight refs hold full (K, N) matrices resident in VMEM; h stays f32.
    """
    o_ref = rest[-1]
    res_refs = rest[:-1]

    h = jnp.maximum(
        jnp.dot(x_ref[...], w1_ref[...], preferred_element_type=jnp.float32),
        0.0)
    for i in range(num_res):
        t = jnp.maximum(
            jnp.dot(h.astype(compute_dtype), res_refs[2 * i][...],
                    preferred_element_type=jnp.float32), 0.0)
        t = jnp.maximum(
            jnp.dot(t.astype(compute_dtype), res_refs[2 * i + 1][...],
                    preferred_element_type=jnp.float32), 0.0)
        h = h + t
    o_ref[...] = h.astype(o_ref.dtype)


def _linear_kernel_1pass(*refs, has_residual):
    """o = relu(x @ w) (+ r); K fits in one block, no accumulator scratch."""
    if has_residual:
        x_ref, w_ref, r_ref, o_ref = refs
    else:
        x_ref, w_ref, o_ref = refs
        r_ref = None
    acc = jnp.dot(x_ref[...], w_ref[...], preferred_element_type=jnp.float32)
    acc = jnp.maximum(acc, 0.0)
    if r_ref is not None:
        acc = acc + r_ref[...].astype(jnp.float32)
    o_ref[...] = acc.astype(o_ref.dtype)


def _linear_kernel_acc(*refs, has_residual):
    """o = relu(x @ w) (+ r); K tiled -> accumulate over grid axis 2."""
    if has_residual:
        x_ref, w_ref, r_ref, o_ref, acc_ref = refs
    else:
        x_ref, w_ref, o_ref, acc_ref = refs
        r_ref = None

    @pl.when(pl.program_id(2) == 0)
    def _():
        acc_ref[...] = jnp.zeros_like(acc_ref)

    acc_ref[...] += jnp.dot(x_ref[...], w_ref[...],
                            preferred_element_type=jnp.float32)

    @pl.when(pl.program_id(2) == pl.num_programs(2) - 1)
    def _():
        acc = jnp.maximum(acc_ref[...], 0.0)
        if r_ref is not None:
            acc = acc + r_ref[...].astype(jnp.float32)
        o_ref[...] = acc.astype(o_ref.dtype)


# ---------------------------------------------------------------------------
# Pallas wrappers
# ---------------------------------------------------------------------------
def _fused_forward(x2d, w1, res_list, out_dtype, compute_dtype):
    """Single pallas_call: h = relu(x@W1); repeat h += relu(relu(h@Wa)@Wb)."""
    M, K = x2d.shape
    N = w1.shape[1]
    num_res = len(res_list) // 2

    tm = _pick_tm(M)
    Mp = _round_up(M, tm)

    xc = x2d.astype(compute_dtype)
    if Mp != M:
        xc = jnp.pad(xc, ((0, Mp - M), (0, 0)))
    w1c = w1.astype(compute_dtype)
    resc = [w.astype(compute_dtype) for w in res_list]

    in_specs = [pl.BlockSpec((tm, K), lambda i: (i, 0)),
                pl.BlockSpec((K, N), lambda i: (0, 0))]
    in_specs += [pl.BlockSpec((N, N), lambda i: (0, 0)) for _ in resc]
    out_spec = pl.BlockSpec((tm, N), lambda i: (i, 0))

    eb = jnp.dtype(compute_dtype).itemsize
    ob = jnp.dtype(out_dtype).itemsize
    weight_bytes = K * N * eb + 2 * num_res * N * N * eb
    flops = 2 * Mp * K * N + num_res * (4 * Mp * N * N)
    bytes_accessed = Mp * K * eb + weight_bytes + Mp * N * ob
    # conservative VMEM estimate (weights possibly double-buffered + act tiles)
    est = (2 * weight_bytes + 2 * tm * K * eb + 2 * tm * N * ob
           + tm * N * 4 + (1 << 20))

    out = pl.pallas_call(
        functools.partial(_fused_fwd_kernel, num_res=num_res,
                          compute_dtype=compute_dtype),
        out_shape=jax.ShapeDtypeStruct((Mp, N), out_dtype),
        grid_spec=pltpu.PrefetchScalarGridSpec(
            num_scalar_prefetch=0,
            grid=(Mp // tm,),
            in_specs=in_specs,
            out_specs=out_spec,
        ),
        compiler_params=pltpu.CompilerParams(
            dimension_semantics=("parallel",),
            vmem_limit_bytes=_vmem_limit_from_estimate(est),
        ),
        cost_estimate=pl.CostEstimate(flops=flops, transcendentals=0,
                                      bytes_accessed=bytes_accessed),
    )(xc, w1c, *resc)
    return out[:M] if Mp != M else out


def _pallas_linear(x2d, w_kn, residual, out_dtype, tm):
    """relu(x2d @ w_kn) (+ residual).  x2d:(Mp,K) w:(K,N) residual:(Mp,N)|None."""
    Mp, K = x2d.shape
    K2, N = w_kn.shape
    assert K == K2 and Mp % tm == 0
    has_res = residual is not None

    tn = N if N <= _TN_CAP else _largest_div(N, _TN_CAP, 128)
    tk = K if K <= _TK_CAP else _largest_div(K, _TK_CAP, 128)

    xb = jnp.dtype(x2d.dtype).itemsize
    wb = jnp.dtype(w_kn.dtype).itemsize
    ob = jnp.dtype(out_dtype).itemsize
    rb = jnp.dtype(residual.dtype).itemsize if has_res else 0
    cost = pl.CostEstimate(
        flops=2 * Mp * K * N, transcendentals=0,
        bytes_accessed=(Mp * K * xb + K * N * wb + Mp * N * ob
                        + (Mp * N * rb if has_res else 0)))
    est = (2 * (tm * tk * xb + tk * tn * wb) + 2 * tm * tn * ob
           + tm * tn * 4 + (2 * tm * tn * rb if has_res else 0) + (1 << 20))

    if tk == K:
        # K collapsed: no accumulator scratch, no init/finalize branches.
        grid = (Mp // tm, N // tn)
        in_specs = [pl.BlockSpec((tm, K), lambda i, j: (i, 0)),
                    pl.BlockSpec((K, tn), lambda i, j: (0, j))]
        if has_res:
            in_specs.append(pl.BlockSpec((tm, tn), lambda i, j: (i, j)))
        out_spec = pl.BlockSpec((tm, tn), lambda i, j: (i, j))
        kernel = functools.partial(_linear_kernel_1pass, has_residual=has_res)
        scratch = []
        dims = ("parallel", "parallel")
    else:
        grid = (Mp // tm, N // tn, K // tk)
        in_specs = [pl.BlockSpec((tm, tk), lambda i, j, k: (i, k)),
                    pl.BlockSpec((tk, tn), lambda i, j, k: (k, j))]
        if has_res:
            in_specs.append(pl.BlockSpec((tm, tn), lambda i, j, k: (i, j)))
        out_spec = pl.BlockSpec((tm, tn), lambda i, j, k: (i, j))
        kernel = functools.partial(_linear_kernel_acc, has_residual=has_res)
        scratch = [pltpu.VMEM((tm, tn), jnp.float32)]
        dims = ("parallel", "parallel", "arbitrary")

    args = (x2d, w_kn) + ((residual,) if has_res else ())
    return pl.pallas_call(
        kernel,
        out_shape=jax.ShapeDtypeStruct((Mp, N), out_dtype),
        grid_spec=pltpu.PrefetchScalarGridSpec(
            num_scalar_prefetch=0,
            grid=grid,
            in_specs=in_specs,
            out_specs=out_spec,
            scratch_shapes=scratch,
        ),
        compiler_params=pltpu.CompilerParams(
            dimension_semantics=dims,
            vmem_limit_bytes=_vmem_limit_from_estimate(est),
        ),
        cost_estimate=cost,
    )(*args)


def _unfused_forward(x2d, w1, res_list, out_dtype, compute_dtype):
    """Fallback when the weight set does not fit VMEM: per-layer tiled kernels."""
    M = x2d.shape[0]
    tm = _pick_tm(M)
    Mp = _round_up(M, tm)
    xc = x2d.astype(compute_dtype)
    if Mp != M:
        xc = jnp.pad(xc, ((0, Mp - M), (0, 0)))

    h = _pallas_linear(xc, w1.astype(compute_dtype), None, jnp.float32, tm)
    num_res = len(res_list) // 2
    for i in range(num_res):
        wa = res_list[2 * i].astype(compute_dtype)
        wb = res_list[2 * i + 1].astype(compute_dtype)
        t = _pallas_linear(h.astype(compute_dtype), wa, None, compute_dtype, tm)
        h = _pallas_linear(t, wb, h, jnp.float32, tm)
    y = h.astype(out_dtype)
    return y[:M] if Mp != M else y


# ---------------------------------------------------------------------------
# DimReduction forward + params
# ---------------------------------------------------------------------------
def init_dim_reduction_params(key, in_chans, out_chans, num_layer_res):
    """Deterministic synthetic params.  Generated PyTorch-style (out, in), then
    transposed ONCE here to (in, out) so the forward never transposes."""
    keys = jax.random.split(key, 1 + 2 * num_layer_res)
    s1 = 1.0 / (in_chans ** 0.5)
    fc1 = jax.random.uniform(keys[0], (out_chans, in_chans), jnp.float32, -s1, s1)
    res = []
    s2 = 1.0 / (out_chans ** 0.5)
    for i in range(num_layer_res):
        wa = jax.random.uniform(keys[1 + 2 * i], (out_chans, out_chans),
                                jnp.float32, -s2, s2)
        wb = jax.random.uniform(keys[2 + 2 * i], (out_chans, out_chans),
                                jnp.float32, -s2, s2)
        res.append(jnp.asarray(wa.T))
        res.append(jnp.asarray(wb.T))
    return {"fc1_t": jnp.asarray(fc1.T), "res_t": tuple(res)}


@functools.partial(jax.jit, static_argnames=("compute_dtype", "use_fused"))
def dim_reduction_forward(x, params, compute_dtype=jnp.bfloat16, use_fused=None):
    """Matches DimReduction.forward: relu(fc1(x)) then residual blocks."""
    w1 = params["fc1_t"]                      # (in_chans, out_chans)
    res_list = params["res_t"]                # tuple of (out, out) in (K, N) layout
    in_chans, out_chans = w1.shape
    lead = x.shape[:-1]
    x2d = x.reshape(-1, in_chans)
    out_dtype = x.dtype
    num_res = len(res_list) // 2

    if use_fused is None:
        eb = jnp.dtype(compute_dtype).itemsize
        weight_bytes = (in_chans * out_chans * eb
                        + 2 * num_res * out_chans * out_chans * eb)
        use_fused = weight_bytes <= _FUSED_WEIGHT_BUDGET

    if use_fused:
        y = _fused_forward(x2d, w1, res_list, out_dtype, compute_dtype)
    else:
        y = _unfused_forward(x2d, w1, res_list, out_dtype, compute_dtype)
    return y.reshape(lead + (out_chans,))


def dim_reduction_reference(x, params, compute_dtype=jnp.float32):
    """Pure-JAX reference using the same cast scheme as the Pallas path."""
    w1 = params["fc1_t"]
    res_list = params["res_t"]
    lead = x.shape[:-1]
    cd = compute_dtype
    x2d = x.reshape(-1, w1.shape[0])
    h = jnp.maximum(
        jnp.dot(x2d.astype(cd), w1.astype(cd),
                preferred_element_type=jnp.float32), 0.0)
    for i in range(len(res_list) // 2):
        wa = res_list[2 * i].astype(cd)
        wb = res_list[2 * i + 1].astype(cd)
        t = jnp.maximum(jnp.dot(h.astype(cd), wa,
                                preferred_element_type=jnp.float32), 0.0)
        t = jnp.maximum(jnp.dot(t.astype(cd), wb,
                                preferred_element_type=jnp.float32), 0.0)
        h = h + t
    return h.astype(x.dtype).reshape(lead + (w1.shape[1],))


# ---------------------------------------------------------------------------
if __name__ == "__main__":
    key = jax.random.PRNGKey(0)
    k_x, k_p = jax.random.split(key)

    batch, seq = 2, 16
    in_chans, out_chans = 256, 256
    num_layer_res = 2      # exercise the residual loop with >1 block

    x = jax.random.normal(k_x, (batch, seq, in_chans), dtype=jnp.float32)
    params = init_dim_reduction_params(k_p, in_chans, out_chans, num_layer_res)

    # 1) Primary path: fused single-kernel forward, bf16 MXU / f32 accumulate.
    out_bf16 = jax.block_until_ready(
        dim_reduction_forward(x, params, compute_dtype=jnp.bfloat16))
    ref_bf16 = dim_reduction_reference(x, params, compute_dtype=jnp.bfloat16)
    assert out_bf16.shape == (batch, seq, out_chans)
    assert jnp.allclose(out_bf16, ref_bf16, atol=3e-2, rtol=3e-2), "fused bf16 mismatch"

    # 2) Fused path with full f32 compute (tight check).
    out_f32 = jax.block_until_ready(
        dim_reduction_forward(x, params, compute_dtype=jnp.float32))
    ref_f32 = dim_reduction_reference(x, params, compute_dtype=jnp.float32)
    assert jnp.allclose(out_f32, ref_f32, atol=1e-3, rtol=1e-3), "fused f32 mismatch"

    # 3) Fallback tiled path (forced) — used when weights exceed the VMEM budget.
    out_tiled = jax.block_until_ready(
        dim_reduction_forward(x, params, compute_dtype=jnp.bfloat16, use_fused=False))
    assert jnp.allclose(out_tiled, ref_bf16, atol=3e-2, rtol=3e-2), "tiled bf16 mismatch"

    # 4) numLayer_Res == 0 path (fc1 + relu only).
    params0 = init_dim_reduction_params(k_p, in_chans, out_chans, 0)
    out0 = jax.block_until_ready(
        dim_reduction_forward(x, params0, compute_dtype=jnp.bfloat16))
    ref0 = dim_reduction_reference(x, params0, compute_dtype=jnp.bfloat16)
    assert jnp.allclose(out0, ref0, atol=3e-2, rtol=3e-2), "fc1-only mismatch"

    print("KERNEL_OK")
</pallas_src>

<mosaic_0001>
module attributes {stable_mosaic.version = 11 : i64} {
  func.func @_fused_fwd_kernel(%arg0: i32, %arg1: memref<16x256xbf16, #tpu.memory_space<vmem>>, %arg2: memref<256x256xbf16, #tpu.memory_space<vmem>>, %arg3: memref<256x256xbf16, #tpu.memory_space<vmem>>, %arg4: memref<256x256xbf16, #tpu.memory_space<vmem>>, %arg5: memref<256x256xbf16, #tpu.memory_space<vmem>>, %arg6: memref<256x256xbf16, #tpu.memory_space<vmem>>, %arg7: memref<16x256xf32, #tpu.memory_space<vmem>>) attributes {dimension_semantics = [#tpu.dimension_semantics<parallel>], iteration_bounds = array<i64: 2>, scalar_prefetch = 0 : i64, scratch_operands = 0 : i64, tpu.core_type = #tpu.core_type<tc>, window_params = [{transform_indices = @transform_0, window_bounds = array<i64: 16, 256>}, {pipeline_mode = #tpu.pipeline_mode<synchronous>, transform_indices = @transform_1, window_bounds = array<i64: 256, 256>}, {pipeline_mode = #tpu.pipeline_mode<synchronous>, transform_indices = @transform_2, window_bounds = array<i64: 256, 256>}, {pipeline_mode = #tpu.pipeline_mode<synchronous>, transform_indices = @transform_3, window_bounds = array<i64: 256, 256>}, {pipeline_mode = #tpu.pipeline_mode<synchronous>, transform_indices = @transform_4, window_bounds = array<i64: 256, 256>}, {pipeline_mode = #tpu.pipeline_mode<synchronous>, transform_indices = @transform_5, window_bounds = array<i64: 256, 256>}, {transform_indices = @transform_6, window_bounds = array<i64: 16, 256>}]} {
    %c0 = arith.constant 0 : index
    %c0_0 = arith.constant 0 : index
    %0 = vector.load %arg1[%c0, %c0_0] : memref<16x256xbf16, #tpu.memory_space<vmem>>, vector<16x256xbf16>
    %c0_1 = arith.constant 0 : index
    %c0_2 = arith.constant 0 : index
    %1 = vector.load %arg2[%c0_1, %c0_2] : memref<256x256xbf16, #tpu.memory_space<vmem>>, vector<256x256xbf16>
    %cst = arith.constant dense<0.000000e+00> : vector<16x256xf32>
    %2 = tpu.matmul %0, %1, %cst {dimension_numbers = #tpu.dot_dimension_numbers<[1], [0], [0], [1], [0, 0, 1, 1], [], []>} : vector<16x256xbf16>, vector<256x256xbf16>, vector<16x256xf32> -> vector<16x256xf32>
    %cst_3 = arith.constant 0.000000e+00 : f32
    %3 = vector.broadcast %cst_3 : f32 to vector<16x256xf32>
    %4 = arith.maximumf %2, %3 : vector<16x256xf32>
    %5 = arith.truncf %4 : vector<16x256xf32> to vector<16x256xbf16>
    %c0_4 = arith.constant 0 : index
    %c0_5 = arith.constant 0 : index
    %6 = vector.load %arg3[%c0_4, %c0_5] : memref<256x256xbf16, #tpu.memory_space<vmem>>, vector<256x256xbf16>
    %cst_6 = arith.constant dense<0.000000e+00> : vector<16x256xf32>
    %7 = tpu.matmul %5, %6, %cst_6 {dimension_numbers = #tpu.dot_dimension_numbers<[1], [0], [0], [1], [0, 0, 1, 1], [], []>} : vector<16x256xbf16>, vector<256x256xbf16>, vector<16x256xf32> -> vector<16x256xf32>
    %cst_7 = arith.constant 0.000000e+00 : f32
    %8 = vector.broadcast %cst_7 : f32 to vector<16x256xf32>
    %9 = arith.maximumf %7, %8 : vector<16x256xf32>
    %10 = arith.truncf %9 : vector<16x256xf32> to vector<16x256xbf16>
    %c0_8 = arith.constant 0 : index
    %c0_9 = arith.constant 0 : index
    %11 = vector.load %arg4[%c0_8, %c0_9] : memref<256x256xbf16, #tpu.memory_space<vmem>>, vector<256x256xbf16>
    %cst_10 = arith.constant dense<0.000000e+00> : vector<16x256xf32>
    %12 = tpu.matmul %10, %11, %cst_10 {dimension_numbers = #tpu.dot_dimension_numbers<[1], [0], [0], [1], [0, 0, 1, 1], [], []>} : vector<16x256xbf16>, vector<256x256xbf16>, vector<16x256xf32> -> vector<16x256xf32>
    %cst_11 = arith.constant 0.000000e+00 : f32
    %13 = vector.broadcast %cst_11 : f32 to vector<16x256xf32>
    %14 = arith.maximumf %12, %13 : vector<16x256xf32>
    %15 = arith.addf %4, %14 : vector<16x256xf32>
    %16 = arith.truncf %15 : vector<16x256xf32> to vector<16x256xbf16>
    %c0_12 = arith.constant 0 : index
    %c0_13 = arith.constant 0 : index
    %17 = vector.load %arg5[%c0_12, %c0_13] : memref<256x256xbf16, #tpu.memory_space<vmem>>, vector<256x256xbf16>
    %cst_14 = arith.constant dense<0.000000e+00> : vector<16x256xf32>
    %18 = tpu.matmul %16, %17, %cst_14 {dimension_numbers = #tpu.dot_dimension_numbers<[1], [0], [0], [1], [0, 0, 1, 1], [], []>} : vector<16x256xbf16>, vector<256x256xbf16>, vector<16x256xf32> -> vector<16x256xf32>
    %cst_15 = arith.constant 0.000000e+00 : f32
    %19 = vector.broadcast %cst_15 : f32 to vector<16x256xf32>
    %20 = arith.maximumf %18, %19 : vector<16x256xf32>
    %21 = arith.truncf %20 : vector<16x256xf32> to vector<16x256xbf16>
    %c0_16 = arith.constant 0 : index
    %c0_17 = arith.constant 0 : index
    %22 = vector.load %arg6[%c0_16, %c0_17] : memref<256x256xbf16, #tpu.memory_space<vmem>>, vector<256x256xbf16>
    %cst_18 = arith.constant dense<0.000000e+00> : vector<16x256xf32>
    %23 = tpu.matmul %21, %22, %cst_18 {dimension_numbers = #tpu.dot_dimension_numbers<[1], [0], [0], [1], [0, 0, 1, 1], [], []>} : vector<16x256xbf16>, vector<256x256xbf16>, vector<16x256xf32> -> vector<16x256xf32>
    %cst_19 = arith.constant 0.000000e+00 : f32
    %24 = vector.broadcast %cst_19 : f32 to vector<16x256xf32>
    %25 = arith.maximumf %23, %24 : vector<16x256xf32>
    %26 = arith.addf %15, %25 : vector<16x256xf32>
    %c0_20 = arith.constant 0 : index
    %c0_21 = arith.constant 0 : index
    %27 = vector.load %arg7[%c0_20, %c0_21] : memref<16x256xf32, #tpu.memory_space<vmem>>, vector<16x256xf32>
    tpu.vector_store %arg7[%c0_20, %c0_21], %26 {strides = array<i32>} : memref<16x256xf32, #tpu.memory_space<vmem>>, vector<16x256xf32>,
    return
  }
  func.func @transform_0(%arg0: i32) -> (i32, i32) {
    %c0_i32 = arith.constant 0 : i32
    %c0_i32_0 = arith.constant 0 : i32
    return %arg0, %c0_i32 : i32, i32
  }
  func.func @transform_1(%arg0: i32) -> (i32, i32) {
    %c0_i32 = arith.constant 0 : i32
    %c0_i32_0 = arith.constant 0 : i32
    %c0_i32_1 = arith.constant 0 : i32
    return %c0_i32, %c0_i32_0 : i32, i32
  }
  func.func @transform_2(%arg0: i32) -> (i32, i32) {
    %c0_i32 = arith.constant 0 : i32
    %c0_i32_0 = arith.constant 0 : i32
    %c0_i32_1 = arith.constant 0 : i32
    return %c0_i32, %c0_i32_0 : i32, i32
  }
  func.func @transform_3(%arg0: i32) -> (i32, i32) {
    %c0_i32 = arith.constant 0 : i32
    %c0_i32_0 = arith.constant 0 : i32
    %c0_i32_1 = arith.constant 0 : i32
    return %c0_i32, %c0_i32_0 : i32, i32
  }
  func.func @transform_4(%arg0: i32) -> (i32, i32) {
    %c0_i32 = arith.constant 0 : i32
    %c0_i32_0 = arith.constant 0 : i32
    %c0_i32_1 = arith.constant 0 : i32
    return %c0_i32, %c0_i32_0 : i32, i32
  }
  func.func @transform_5(%arg0: i32) -> (i32, i32) {
    %c0_i32 = arith.constant 0 : i32
    %c0_i32_0 = arith.constant 0 : i32
    %c0_i32_1 = arith.constant 0 : i32
    return %c0_i32, %c0_i32_0 : i32, i32
  }
  func.func @transform_6(%arg0: i32) -> (i32, i32) {
    %c0_i32 = arith.constant 0 : i32
    %c0_i32_0 = arith.constant 0 : i32
    return %arg0, %c0_i32 : i32, i32
  }
}

</mosaic_0001>

<bundles_post_ra>
// kernel: dim_reduction_forward.1
= control target key start
LH: loop header
LB: loop body
LE: loop exit
PB: predicated region body
PF: predicated region fallthrough
CT: control target
= control target key end

     0   :  { %11 = vsyncpa [#allocation3], 0  ;;  %s2739_s0 = inlined_call_operand.vmem [shape: bf16[32,256], index: 0, kind: input, shape index: {}]   ;;  %s2740_s1 = inlined_call_operand.vmem [shape: bf16[256,256], index: 1, kind: input, shape index: {}]   ;;  %s2741_s2 = inlined_call_operand.vmem [shape: bf16[256,256], index: 2, kind: input, shape index: {}]   ;;  %s2742_s3 = inlined_call_operand.vmem [shape: bf16[256,256], index: 3, kind: input, shape index: {}]   ;;  %s2743_s4 = inlined_call_operand.vmem [shape: bf16[256,256], index: 4, kind: input, shape index: {}]   ;;  %s2744_s5 = inlined_call_operand.vmem [shape: bf16[256,256], index: 5, kind: input, shape index: {}]   ;;  %s2745_s6 = inlined_call_operand.hbm [shape: f32[32,256], index: 6, kind: output, shape index: {}]  }
   0x1   :  { %13 = vsyncpa [#allocation3 + $0x1], 0  ;;  %s2125_s21 = smov 0   ;;  %s2127_s22 = smov 0  }
   0x2   :  { %s2129_s23 = smov 0   ;;  %s2131_s24 = smov 0  }
   0x3 LB: > { %s2146_s25 = sadd.s32 4294967295, %s2085_s24   ;;  %s1560_s26 = sadd.s32 4294967294, %s2085_s24   ;;  %s2085_s24 = sphi %s2131_s24, %s2751_s24   ;;  %s2081_s23 = sphi %s2129_s23, %s2750_s23   ;;  %s2077_s22 = sphi %s2127_s22, %s2749_s22   ;;  %s2073_s21 = sphi %s2125_s21, %s2748_s21  }
   0x4   : > { %s2150_s27 = sadd.s32 1, %s2085_s24   ;;  %s157_s28 = sadd.s32 1, %s2081_s23 }
   0x5   : > { %s154_s29 = ssub.s32 %s2085_s24, %s2150_s27  ;;  %p167_p0 = scmp.ne.s32.totalorder %s2081_s23, %s2077_s22 }
   0x6   : > { %p155_p1 = scmp.eq.s32.totalorder %s154_s29, 0  ;;  %p168_p2 = scmp.eq.s32.totalorder %s2146_s25, 1 }
   0x7   : > { %p173_p3 = scmp.ne.s32.totalorder %s2077_s22, %s2073_s21  ;;  %p174_p4 = scmp.eq.s32.totalorder %s1560_s26, 1 }
   0x8   : > { %s2161_s30 = scalar_select %p155_p1, %s2081_s23, %s157_s28  }
   0x9   : > { %p2163_p5 = por %p168_p2, %p167_p0  ;;  %p2167_p6 = por %p174_p4, %p173_p3 }
   0xa   : > { %p1563_p7 = scmp.ge.s32.totalorder %s2085_s24, 1  ;;  %p217_p8 = scmp.lt.s32.totalorder %s2085_s24, 3 }
   0xc   : > { %p218_p9 = pnand %p1563_p7, %p217_p8 }
   0xd   : > { %v1780_v0 = vld [vmem:[%s2740_s1 + $0x4] ss:$8 sps:$4 sm:$0xff] (!%p218_p9)   ;;  %v1782_v1 = vld [vmem:[%s2740_s1] ss:$8 sps:$4 sm:$0xff] (!%p218_p9)   ;;  %v1783_v2 = vld [vmem:[%s2740_s1 + $0x14] ss:$8 sps:$4 sm:$0xff] (!%p218_p9)  }
   0xe   : > { %221 = sbr.rel (%p218_p9) target bundleno = 1194 (0x4aa), region = 44  ;;  %460 = vmatprep.subr.bf16.mxu0 (!%p218_p9), %v1780_v0  ;;  %v1785_v3 = vld [vmem:[%s2740_s1 + $0x10] ss:$8 sps:$4 sm:$0xff] (!%p218_p9)   ;;  %v1786_v4 = vld [vmem:[%s2740_s1 + $0x24] ss:$8 sps:$4 sm:$0xff] (!%p218_p9)   ;;  %s1565_s19 = sshll.u32 (!%p218_p9), %s2146_s25, 1 }
   0xf   : > { %461 = vmatpush1.bf16.msra.mxu0 (!%p218_p9), %v1782_v1  ;;  %v1788_v5 = vld [vmem:[%s2740_s1 + $0x20] ss:$8 sps:$4 sm:$0xff] (!%p218_p9)   ;;  %v1789_v6 = vld [vmem:[%s2740_s1 + $0x34] ss:$8 sps:$4 sm:$0xff] (!%p218_p9)   ;;  %p249_p10 = scmp.lt.s32.totalorder (!%p218_p9), %s1565_s19, 3  ;;  %s245_s11 = sand.u32 (!%p218_p9), 1, %s2077_s22  }
  0x10   : > { %462 = vmatprep.subr.bf16.mxu0 (!%p218_p9), %v1783_v2  ;;  %v1791_v7 = vld [vmem:[%s2740_s1 + $0x30] ss:$8 sps:$4 sm:$0xff] (!%p218_p9)   ;;  %v1792_v8 = vld [vmem:[%s2740_s1 + $0x44] ss:$8 sps:$4 sm:$0xff] (!%p218_p9)   ;;  %v1794_v9 = vld [vmem:[%s2740_s1 + $0x40] ss:$8 sps:$4 sm:$0xff] (!%p218_p9)  }
  0x11   : > { %v1795_v10 = vld [vmem:[%s2740_s1 + $0x54] ss:$8 sps:$4 sm:$0xff] (!%p218_p9)   ;;  %v1797_v11 = vld [vmem:[%s2740_s1 + $0x50] ss:$8 sps:$4 sm:$0xff] (!%p218_p9)   ;;  %v1798_v12 = vld [vmem:[%s2740_s1 + $0x64] ss:$8 sps:$4 sm:$0xff] (!%p218_p9)  }
  0x12   : > { %v1800_v13 = vld [vmem:[%s2740_s1 + $0x60] ss:$8 sps:$4 sm:$0xff] (!%p218_p9)   ;;  %v1801_v14 = vld [vmem:[%s2740_s1 + $0x74] ss:$8 sps:$4 sm:$0xff] (!%p218_p9)   ;;  %v1831_v16 = vld [vmem:[%s2741_s2 + $0x4] ss:$8 sps:$4 sm:$0xff] (!%p218_p9)  }
  0x13   : > { %463 = vmatpush1.bf16.msra.mxu0 (!%p218_p9), %v1785_v3  ;;  %v1833_v17 = vld [vmem:[%s2741_s2] ss:$8 sps:$4 sm:$0xff] (!%p218_p9)   ;;  %v1834_v18 = vld [vmem:[%s2741_s2 + $0x14] ss:$8 sps:$4 sm:$0xff] (!%p218_p9)   ;;  %701 = vmatprep.subr.bf16.mxu1 (!%p218_p9), %v1831_v16  ;;  %v1836_v19 = vld [vmem:[%s2741_s2 + $0x10] ss:$8 sps:$4 sm:$0xff] (!%p218_p9)  }
  0x14   : > { %464 = vmatprep.subr.bf16.mxu0 (!%p218_p9), %v1786_v4  ;;  %702 = vmatpush1.bf16.msra.mxu1 (!%p218_p9), %v1833_v17  ;;  %v1803_v20 = vld [vmem:[%s2740_s1 + $0x70] ss:$8 sps:$4 sm:$0xff] (!%p218_p9)   ;;  %v1837_v21 = vld [vmem:[%s2741_s2 + $0x24] ss:$8 sps:$4 sm:$0xff] (!%p218_p9)   ;;  %v1839_v23 = vld [vmem:[%s2741_s2 + $0x20] ss:$8 sps:$4 sm:$0xff] (!%p218_p9)  }
  0x15   : > { %s2753_s19 = smov (!%p249_p10, %s1565_s19), 3  ;;  %703 = vmatprep.subr.bf16.mxu1 %v1834_v18  ;;  %v1804_v22 = vld [vmem:[%s2740_s1 + $0x84] ss:$8 sps:$4 sm:$0xff]   ;;  %v1806_v24 = vld [vmem:[%s2740_s1 + $0x80] ss:$8 sps:$4 sm:$0xff]   ;;  %s1564_s12 = sshll.u32 %s245_s11, 5 }
  0x16   : > { %s1736_s17 = sshll.u32 %s2753_s19, 3  ;;  %v1840_v25 = vld [vmem:[%s2741_s2 + $0x34] ss:$8 sps:$4 sm:$0xff]   ;;  %v1842_v27 = vld [vmem:[%s2741_s2 + $0x30] ss:$8 sps:$4 sm:$0xff]   ;;  %s247_s19 = scalar_lea.vmem [#allocation2], %s1564_s12 }
  0x17   : > { %465 = vmatpush1.bf16.msra.mxu0 %v1788_v5  ;;  %s2213_s29 = scalar_lea.vmem %s2739_s0, %s1736_s17  ;;  %v1807_v26 = vld [vmem:[%s2740_s1 + $0x94] ss:$8 sps:$4 sm:$0xff]   ;;  %v1809_v28 = vld [vmem:[%s2740_s1 + $0x90] ss:$8 sps:$4 sm:$0xff]   ;;  %v1843_v29 = vld [vmem:[%s2741_s2 + $0x44] ss:$8 sps:$4 sm:$0xff]  }
  0x18   : > { %466 = vmatprep.subr.bf16.mxu0 %v1789_v6  ;;  %v1830_v15 = vld [vmem:[%s2213_s29 + $0x4] ss:$8 sps:$4 sm:$0xff]   ;;  %704 = vmatpush1.bf16.msra.mxu1 %v1836_v19  ;;  %v1812_v31 = vld [vmem:[%s2740_s1 + $0xa0] ss:$8 sps:$4 sm:$0xff]   ;;  %v1813_v33 = vld [vmem:[%s2740_s1 + $0xb4] ss:$8 sps:$4 sm:$0xff]  }
  0x19   : > { %492 = vmatprep.mubr.bf16.mxu0 %v1830_v15  ;;  %705 = vmatprep.subr.bf16.mxu1 %v1837_v21  ;;  %v1810_v30 = vld [vmem:[%s2740_s1 + $0xa4] ss:$8 sps:$4 sm:$0xff]   ;;  %v1845_v32 = vld [vmem:[%s2741_s2 + $0x40] ss:$8 sps:$4 sm:$0xff]   ;;  %v1846_v34 = vld [vmem:[%s2741_s2 + $0x54] ss:$8 sps:$4 sm:$0xff]  }
  0x1a   : > { %v1848_v35 = vld [vmem:[%s2741_s2 + $0x50] ss:$8 sps:$4 sm:$0xff]   ;;  %v1849_v37 = vld [vmem:[%s2741_s2 + $0x64] ss:$8 sps:$4 sm:$0xff]   ;;  %v1851_v39 = vld [vmem:[%s2741_s2 + $0x60] ss:$8 sps:$4 sm:$0xff]  }
  0x1b   : > { %467 = vmatpush1.bf16.msra.mxu0 %v1791_v7  ;;  %v1815_v36 = vld [vmem:[%s2740_s1 + $0xb0] ss:$8 sps:$4 sm:$0xff]   ;;  %v1816_v38 = vld [vmem:[%s2740_s1 + $0xc4] ss:$8 sps:$4 sm:$0xff]   ;;  %v1818_v40 = vld [vmem:[%s2740_s1 + $0xc0] ss:$8 sps:$4 sm:$0xff]  }
  0x1c   : > { %468 = vmatprep.subr.bf16.mxu0 %v1792_v8  ;;  %706 = vmatpush1.bf16.msra.mxu1 %v1839_v23  ;;  %v1852_v41 = vld [vmem:[%s2741_s2 + $0x74] ss:$8 sps:$4 sm:$0xff]   ;;  %v1854_v43 = vld [vmem:[%s2741_s2 + $0x70] ss:$8 sps:$4 sm:$0xff]   ;;  %v1855_v45 = vld [vmem:[%s2741_s2 + $0x84] ss:$8 sps:$4 sm:$0xff]  }
  0x1d   : > { %707 = vmatprep.subr.bf16.mxu1 %v1840_v25  ;;  %v1819_v42 = vld [vmem:[%s2740_s1 + $0xd4] ss:$8 sps:$4 sm:$0xff]   ;;  %v1821_v44 = vld [vmem:[%s2740_s1 + $0xd0] ss:$8 sps:$4 sm:$0xff]   ;;  %v1822_v46 = vld [vmem:[%s2740_s1 + $0xe4] ss:$8 sps:$4 sm:$0xff]  }
  0x1e   : > { %v1857_v47 = vld [vmem:[%s2741_s2 + $0x80] ss:$8 sps:$4 sm:$0xff]   ;;  %v1858_v49 = vld [vmem:[%s2741_s2 + $0x94] ss:$8 sps:$4 sm:$0xff]   ;;  %v1860_v51 = vld [vmem:[%s2741_s2 + $0x90] ss:$8 sps:$4 sm:$0xff]  }
  0x1f   : > { %469 = vmatpush1.bf16.msra.mxu0 %v1794_v9  ;;  %v1824_v48 = vld [vmem:[%s2740_s1 + $0xe0] ss:$8 sps:$4 sm:$0xff]   ;;  %v1825_v50 = vld [vmem:[%s2740_s1 + $0xf4] ss:$8 sps:$4 sm:$0xff]   ;;  %v1827_v52 = vld [vmem:[%s2740_s1 + $0xf0] ss:$8 sps:$4 sm:$0xff]  }
  0x20   : > { %470 = vmatprep.subr.bf16.mxu0 %v1795_v10  ;;  %708 = vmatpush1.bf16.msra.mxu1 %v1842_v27  ;;  %v1861_v53 = vld [vmem:[%s2741_s2 + $0xa4] ss:$8 sps:$4 sm:$0xff]   ;;  %v1828_v54 = vld [vmem:[%s2213_s29] ss:$8 sps:$4 sm:$0xff]   ;;  %v1864_v56 = vld [vmem:[%s2741_s2 + $0xb4] ss:$8 sps:$4 sm:$0xff]  }
  0x21   : > { %709 = vmatprep.subr.bf16.mxu1 %v1843_v29  ;;  %v1863_v55 = vld [vmem:[%s2741_s2 + $0xa0] ss:$8 sps:$4 sm:$0xff]   ;;  %v1866_v57 = vld [vmem:[%s2741_s2 + $0xb0] ss:$8 sps:$4 sm:$0xff]   ;;  %v1867_v58 = vld [vmem:[%s2741_s2 + $0xc4] ss:$8 sps:$4 sm:$0xff]  }
  0x22   : > { %v1869_v59 = vld [vmem:[%s2741_s2 + $0xc0] ss:$8 sps:$4 sm:$0xff]   ;;  %v1870_v60 = vld [vmem:[%s2741_s2 + $0xd4] ss:$8 sps:$4 sm:$0xff]   ;;  %v1872_v61 = vld [vmem:[%s2741_s2 + $0xd0] ss:$8 sps:$4 sm:$0xff]  }
  0x23   : > { %471 = vmatpush1.bf16.msra.mxu0 %v1797_v11  ;;  %v1873_v62 = vld [vmem:[%s2741_s2 + $0xe4] ss:$8 sps:$4 sm:$0xff]   ;;  %v1875_v63 = vld [vmem:[%s2741_s2 + $0xe0] ss:$8 sps:$4 sm:$0xff]   ;;  %v1876_v0 = vld [vmem:[%s2741_s2 + $0xf4] ss:$8 sps:$4 sm:$0xff]  }
  0x24   : > { %472 = vmatprep.subr.bf16.mxu0 %v1798_v12  ;;  %710 = vmatpush1.bf16.msra.mxu1 %v1845_v32  ;;  %v1878_v1 = vld [vmem:[%s2741_s2 + $0xf0] ss:$8 sps:$4 sm:$0xff]   ;;  %v1879_v2 = vld [vmem:[%s2742_s3] ss:$8 sps:$4 sm:$0xff]   ;;  %v1881_v3 = vld [vmem:[%s2742_s3 + $0x4] ss:$8 sps:$4 sm:$0xff]  }
  0x25   : > { %711 = vmatprep.subr.bf16.mxu1 %v1846_v34  ;;  %v1884_v4 = vld [vmem:[%s2742_s3 + $0x14] ss:$8 sps:$4 sm:$0xff]   ;;  %v1882_v5 = vld [vmem:[%s2742_s3 + $0x10] ss:$8 sps:$4 sm:$0xff]   ;;  %v1887_v6 = vld [vmem:[%s2742_s3 + $0x24] ss:$8 sps:$4 sm:$0xff]  }
  0x26   : > { %v1885_v7 = vld [vmem:[%s2742_s3 + $0x20] ss:$8 sps:$4 sm:$0xff]   ;;  %v1890_v8 = vld [vmem:[%s2742_s3 + $0x34] ss:$8 sps:$4 sm:$0xff]   ;;  %v1888_v9 = vld [vmem:[%s2742_s3 + $0x30] ss:$8 sps:$4 sm:$0xff]  }
  0x27   : > { %473 = vmatpush1.bf16.msra.mxu0 %v1800_v13  ;;  %v1893_v10 = vld [vmem:[%s2742_s3 + $0x44] ss:$8 sps:$4 sm:$0xff]   ;;  %v1891_v11 = vld [vmem:[%s2742_s3 + $0x40] ss:$8 sps:$4 sm:$0xff]   ;;  %v1896_v12 = vld [vmem:[%s2742_s3 + $0x54] ss:$8 sps:$4 sm:$0xff]  }
  0x28   : > { %474 = vmatprep.subr.bf16.mxu0 %v1801_v14  ;;  %712 = vmatpush1.bf16.msra.mxu1 %v1848_v35  ;;  %v1894_v13 = vld [vmem:[%s2742_s3 + $0x50] ss:$8 sps:$4 sm:$0xff]   ;;  %v1899_v14 = vld [vmem:[%s2742_s3 + $0x64] ss:$8 sps:$4 sm:$0xff]   ;;  %v1897_v15 = vld [vmem:[%s2742_s3 + $0x60] ss:$8 sps:$4 sm:$0xff]  }
  0x29   : > { %713 = vmatprep.subr.bf16.mxu1 %v1849_v37  ;;  %v1902_v16 = vld [vmem:[%s2742_s3 + $0x74] ss:$8 sps:$4 sm:$0xff]   ;;  %v1900_v17 = vld [vmem:[%s2742_s3 + $0x70] ss:$8 sps:$4 sm:$0xff]   ;;  %v1905_v18 = vld [vmem:[%s2742_s3 + $0x84] ss:$8 sps:$4 sm:$0xff]  }
  0x2a   : > { %v1903_v19 = vld [vmem:[%s2742_s3 + $0x80] ss:$8 sps:$4 sm:$0xff]   ;;  %v1906_v21 = vld [vmem:[%s2742_s3 + $0x90] ss:$8 sps:$4 sm:$0xff]   ;;  %s1498_s13 = sshll.u32 %s247_s19, 4  ;;  %s1738_s29 = sshll.u32 %s2146_s25, 9  ;;  %s2691_s13 = int_to_ptr.vmem [resolvable:$true] %s1498_s13 }
  0x2b   : > { %475 = vmatpush1.bf16.msra.mxu0 %v1803_v20  ;;  %v1908_v20 = vld [vmem:[%s2742_s3 + $0x94] ss:$8 sps:$4 sm:$0xff]   ;;  %v1909_v23 = vld [vmem:[%s2742_s3 + $0xa0] ss:$8 sps:$4 sm:$0xff]   ;;  %v1912_v25 = vld [vmem:[%s2742_s3 + $0xb0] ss:$8 sps:$4 sm:$0xff]   ;;  %s2696_s16 = scalar_lea.hbm %s2745_s6, %s1738_s29 }
  0x2c   : > { %476 = vmatprep.subr.bf16.mxu0 %v1804_v22  ;;  %714 = vmatpush1.bf16.msra.mxu1 %v1851_v39  ;;  %v1911_v22 = vld [vmem:[%s2742_s3 + $0xa4] ss:$8 sps:$4 sm:$0xff]   ;;  %v1915_v27 = vld [vmem:[%s2742_s3 + $0xc0] ss:$8 sps:$4 sm:$0xff]   ;;  %v1918_v29 = vld [vmem:[%s2742_s3 + $0xd0] ss:$8 sps:$4 sm:$0xff]  }
  0x2d   : > { %715 = vmatprep.subr.bf16.mxu1 %v1852_v41  ;;  %v1921_v41 = vld [vmem:[%s2742_s3 + $0xe0] ss:$8 sps:$4 sm:$0xff]   ;;  %s2698_s25 = scalar_lea.sflag [#allocation3], %s245_s11  ;;  %s2023_s17 = scalar_lea.vmem %s2691_s13, 512 }
  0x2e   : > { %p2024_p11 = scmp.ne.s32.totalorder %s2691_s13, %s2023_s17  ;;  %s2087_s18 = smov [#allocation2]  }
  0x2f   : > { %477 = vmatpush1.bf16.msra.mxu0 %v1806_v24  ;;  %v1914_v24 = vld [vmem:[%s2742_s3 + $0xb4] ss:$8 sps:$4 sm:$0xff]   ;;  %s2027_s20 = sshll.u32 %s2087_s18, 4  ;;  %s2028_s20 = int_to_ptr.vmem [resolvable:$false] %s2027_s20 }
  0x30   : > { %478 = vmatprep.subr.bf16.mxu0 %v1807_v26  ;;  %716 = vmatpush1.bf16.msra.mxu1 %v1854_v43  ;;  %v1917_v26 = vld [vmem:[%s2742_s3 + $0xc4] ss:$8 sps:$4 sm:$0xff]   ;;  %v1924_v43 = vld [vmem:[%s2742_s3 + $0xf0] ss:$8 sps:$4 sm:$0xff]   ;;  %p2025_p12 = pnand %p2024_p11, %p2163_p5  ;;  %s2029_s26 = scalar_lea.vmem %s2028_s20, 1024 }
  0x31   : > { %717 = vmatprep.subr.bf16.mxu1 %v1855_v45  ;;  %v1929_v45 = vld [vmem:[%s2743_s4 + $0x4] ss:$8 sps:$4 sm:$0xff]   ;;  %p2030_p0 = scmp.lt.s32.totalorder %s2691_s13, %s2028_s20  ;;  %p2031_p1 = scmp.lt.s32.totalorder %s2029_s26, %s2023_s17 }
  0x32   : > { %p2026_p13 = pneg %p2025_p12 }
  0x33   : > { %479 = vmatpush1.bf16.msra.mxu0 %v1809_v28  ;;  %v1920_v28 = vld [vmem:[%s2742_s3 + $0xd4] ss:$8 sps:$4 sm:$0xff]   ;;  %p2032_p2 = por %p2031_p1, %p2030_p0 }
  0x34   : > { %480 = vmatprep.subr.bf16.mxu0 %v1810_v30  ;;  %718 = vmatpush1.bf16.msra.mxu1 %v1857_v47  ;;  %v1930_v47 = vld [vmem:[%s2743_s4 + $0x10] ss:$8 sps:$4 sm:$0xff]  }
  0x35   : > { %719 = vmatprep.subr.bf16.mxu1 %v1858_v49  ;;  %v1933_v49 = vld [vmem:[%s2743_s4 + $0x20] ss:$8 sps:$4 sm:$0xff]   ;;  %p2033_p3 = pnand %p2032_p2, %p2026_p13 }
  0x37   : > { %481 = vmatpush1.bf16.msra.mxu0 %v1812_v31 }
  0x38   : > { %482 = vmatprep.subr.bf16.mxu0 %v1813_v33  ;;  %720 = vmatpush1.bf16.msra.mxu1 %v1860_v51  ;;  %v1936_v51 = vld [vmem:[%s2743_s4 + $0x30] ss:$8 sps:$4 sm:$0xff]  }
  0x39   : > { %721 = vmatprep.subr.bf16.mxu1 %v1861_v53  ;;  %v1939_v53 = vld [vmem:[%s2743_s4 + $0x40] ss:$8 sps:$4 sm:$0xff]  }
  0x3b   : > { %483 = vmatpush1.bf16.msra.mxu0 %v1815_v36 }
  0x3c   : > { %484 = vmatprep.subr.bf16.mxu0 %v1816_v38  ;;  %722 = vmatpush1.bf16.msra.mxu1 %v1863_v55  ;;  %v1942_v55 = vld [vmem:[%s2743_s4 + $0x50] ss:$8 sps:$4 sm:$0xff]  }
  0x3d   : > { %723 = vmatprep.subr.bf16.mxu1 %v1864_v56  ;;  %v1947_v56 = vld [vmem:[%s2743_s4 + $0x64] ss:$8 sps:$4 sm:$0xff]  }
  0x3f   : > { %485 = vmatpush1.bf16.msra.mxu0 %v1818_v40  ;;  %v1923_v40 = vld [vmem:[%s2742_s3 + $0xe4] ss:$8 sps:$4 sm:$0xff]  }
  0x40   : > { %486 = vmatprep.subr.bf16.mxu0 %v1819_v42  ;;  %724 = vmatpush1.bf16.msra.mxu1 %v1866_v57  ;;  %v1926_v42 = vld [vmem:[%s2742_s3 + $0xf4] ss:$8 sps:$4 sm:$0xff]   ;;  %v1945_v57 = vld [vmem:[%s2743_s4 + $0x60] ss:$8 sps:$4 sm:$0xff]  }
  0x41   : > { %725 = vmatprep.subr.bf16.mxu1 %v1867_v58  ;;  %v1950_v58 = vld [vmem:[%s2743_s4 + $0x74] ss:$8 sps:$4 sm:$0xff]  }
  0x43   : > { %487 = vmatpush1.bf16.msra.mxu0 %v1821_v44  ;;  %v1927_v44 = vld [vmem:[%s2743_s4] ss:$8 sps:$4 sm:$0xff]  }
  0x44   : > { %488 = vmatprep.subr.bf16.mxu0 %v1822_v46  ;;  %726 = vmatpush1.bf16.msra.mxu1 %v1869_v59  ;;  %v1932_v46 = vld [vmem:[%s2743_s4 + $0x14] ss:$8 sps:$4 sm:$0xff]   ;;  %v1948_v59 = vld [vmem:[%s2743_s4 + $0x70] ss:$8 sps:$4 sm:$0xff]  }
  0x45   : > { %727 = vmatprep.subr.bf16.mxu1 %v1870_v60  ;;  %v1953_v60 = vld [vmem:[%s2743_s4 + $0x84] ss:$8 sps:$4 sm:$0xff]  }
  0x47   : > { %489 = vmatpush1.bf16.msra.mxu0 %v1824_v48  ;;  %v1935_v48 = vld [vmem:[%s2743_s4 + $0x24] ss:$8 sps:$4 sm:$0xff]  }
  0x48   : > { %490 = vmatprep.subr.bf16.mxu0 %v1825_v50  ;;  %728 = vmatpush1.bf16.msra.mxu1 %v1872_v61  ;;  %v1938_v50 = vld [vmem:[%s2743_s4 + $0x34] ss:$8 sps:$4 sm:$0xff]   ;;  %v1951_v61 = vld [vmem:[%s2743_s4 + $0x80] ss:$8 sps:$4 sm:$0xff]  }
  0x49   : > { %729 = vmatprep.subr.bf16.mxu1 %v1873_v62  ;;  %v1956_v62 = vld [vmem:[%s2743_s4 + $0x94] ss:$8 sps:$4 sm:$0xff]  }
  0x4b   : > { %491 = vmatpush1.bf16.msra.mxu0 %v1827_v52  ;;  %v1941_v52 = vld [vmem:[%s2743_s4 + $0x44] ss:$8 sps:$4 sm:$0xff]  }
  0x4c   : > { %730 = vmatpush1.bf16.msra.mxu1 %v1875_v63  ;;  %942 = vmatprep.subr.bf16.mxu0 %v1881_v3  ;;  %v1954_v63 = vld [vmem:[%s2743_s4 + $0x90] ss:$8 sps:$4 sm:$0xff]  }
  0x4d   : > { %731 = vmatprep.subr.bf16.mxu1 %v1876_v0  ;;  %v1959_v0 = vld [vmem:[%s2743_s4 + $0xa4] ss:$8 sps:$4 sm:$0xff]   ;;  %v1960_v3 = vld [vmem:[%s2743_s4 + $0xb0] ss:$8 sps:$4 sm:$0xff]  }
  0x4e   : > { %493 = vmatmul.mubr.bf16.vlgmr.msra.gmra.mrb[0].mxu0 %v1828_v54  ;;  %v1944_v54 = vld [vmem:[%s2743_s4 + $0x54] ss:$8 sps:$4 sm:$0xff]  }
  0x4f   : > { %943 = vmatpush1.bf16.msra.mxu0 %v1879_v2  ;;  %v1962_v2 = vld [vmem:[%s2743_s4 + $0xb4] ss:$8 sps:$4 sm:$0xff]  }
  0x50   : > { %732 = vmatpush1.bf16.msra.mxu1 %v1878_v1  ;;  %944 = vmatprep.subr.bf16.mxu0 %v1884_v4  ;;  %v1957_v1 = vld [vmem:[%s2743_s4 + $0xa0] ss:$8 sps:$4 sm:$0xff]   ;;  %v1965_v4 = vld [vmem:[%s2743_s4 + $0xc4] ss:$8 sps:$4 sm:$0xff]  }
  0x51   : > { %1187 = vmatprep.subr.bf16.mxu1 %v1929_v45  ;;  %v1996_v45 = vld [vmem:[%s2744_s5 + $0x70] ss:$8 sps:$4 sm:$0xff]  }
  0x53   : > { %945 = vmatpush1.bf16.msra.mxu0 %v1882_v5  ;;  %v1963_v5 = vld [vmem:[%s2743_s4 + $0xc0] ss:$8 sps:$4 sm:$0xff]  }
  0x54   : > { %946 = vmatprep.subr.bf16.mxu0 %v1887_v6  ;;  %v1968_v6 = vld [vmem:[%s2743_s4 + $0xd4] ss:$8 sps:$4 sm:$0xff]  }
  0x57   : > { %947 = vmatpush1.bf16.msra.mxu0 %v1885_v7  ;;  %v1966_v7 = vld [vmem:[%s2743_s4 + $0xd0] ss:$8 sps:$4 sm:$0xff]  }
  0x58   : > { %948 = vmatprep.subr.bf16.mxu0 %v1890_v8 }
  0x5b   : > { %949 = vmatpush1.bf16.msra.mxu0 %v1888_v9 }
  0x5c   : > { %950 = vmatprep.subr.bf16.mxu0 %v1893_v10 }
  0x5f   : > { %951 = vmatpush1.bf16.msra.mxu0 %v1891_v11 }
  0x60   : > { %952 = vmatprep.subr.bf16.mxu0 %v1896_v12 }
  0x63   : > { %953 = vmatpush1.bf16.msra.mxu0 %v1894_v13 }
  0x64   : > { %954 = vmatprep.subr.bf16.mxu0 %v1899_v14 }
  0x67   : > { %955 = vmatpush1.bf16.msra.mxu0 %v1897_v15 }
  0x68   : > { %956 = vmatprep.subr.bf16.mxu0 %v1902_v16 }
  0x6b   : > { %957 = vmatpush1.bf16.msra.mxu0 %v1900_v17 }
  0x6c   : > { %958 = vmatprep.subr.bf16.mxu0 %v1905_v18  ;;  %v1971_v18 = vld [vmem:[%s2743_s4 + $0xe4] ss:$8 sps:$4 sm:$0xff]  }
  0x6f   : > { %959 = vmatpush1.bf16.msra.mxu0 %v1903_v19  ;;  %v1969_v19 = vld [vmem:[%s2743_s4 + $0xe0] ss:$8 sps:$4 sm:$0xff]  }
  0x70   : > { %960 = vmatprep.subr.bf16.mxu0 %v1908_v20  ;;  %v1974_v20 = vld [vmem:[%s2743_s4 + $0xf4] ss:$8 sps:$4 sm:$0xff]  }
  0x73   : > { %961 = vmatpush1.bf16.msra.mxu0 %v1906_v21  ;;  %v1972_v21 = vld [vmem:[%s2743_s4 + $0xf0] ss:$8 sps:$4 sm:$0xff]  }
  0x74   : > { %962 = vmatprep.subr.bf16.mxu0 %v1911_v22  ;;  %v1975_v22 = vld [vmem:[%s2744_s5] ss:$8 sps:$4 sm:$0xff]  }
  0x77   : > { %963 = vmatpush1.bf16.msra.mxu0 %v1909_v23  ;;  %v1977_v23 = vld [vmem:[%s2744_s5 + $0x4] ss:$8 sps:$4 sm:$0xff]  }
  0x78   : > { %964 = vmatprep.subr.bf16.mxu0 %v1914_v24  ;;  %v1980_v24 = vld [vmem:[%s2744_s5 + $0x14] ss:$8 sps:$4 sm:$0xff]  }
  0x7b   : > { %965 = vmatpush1.bf16.msra.mxu0 %v1912_v25  ;;  %v1978_v25 = vld [vmem:[%s2744_s5 + $0x10] ss:$8 sps:$4 sm:$0xff]  }
  0x7c   : > { %966 = vmatprep.subr.bf16.mxu0 %v1917_v26  ;;  %v1983_v26 = vld [vmem:[%s2744_s5 + $0x24] ss:$8 sps:$4 sm:$0xff]  }
  0x7f   : > { %967 = vmatpush1.bf16.msra.mxu0 %v1915_v27  ;;  %v1981_v27 = vld [vmem:[%s2744_s5 + $0x20] ss:$8 sps:$4 sm:$0xff]  }
  0x80   : > { %968 = vmatprep.subr.bf16.mxu0 %v1920_v28  ;;  %v1986_v28 = vld [vmem:[%s2744_s5 + $0x34] ss:$8 sps:$4 sm:$0xff]  }
  0x83   : > { %969 = vmatpush1.bf16.msra.mxu0 %v1918_v29  ;;  %v1984_v29 = vld [vmem:[%s2744_s5 + $0x30] ss:$8 sps:$4 sm:$0xff]  }
  0x84   : > { %970 = vmatprep.subr.bf16.mxu0 %v1923_v40  ;;  %v1992_v40 = vld [vmem:[%s2744_s5 + $0x54] ss:$8 sps:$4 sm:$0xff]  }
  0x87   : > { %971 = vmatpush1.bf16.msra.mxu0 %v1921_v41  ;;  %v1990_v41 = vld [vmem:[%s2744_s5 + $0x50] ss:$8 sps:$4 sm:$0xff]  }
  0x88   : > { %972 = vmatprep.subr.bf16.mxu0 %v1926_v42  ;;  %v1995_v42 = vld [vmem:[%s2744_s5 + $0x64] ss:$8 sps:$4 sm:$0xff]  }
  0x8b   : > { %973 = vmatpush1.bf16.msra.mxu0 %v1924_v43  ;;  %v1993_v43 = vld [vmem:[%s2744_s5 + $0x60] ss:$8 sps:$4 sm:$0xff]  }
  0x8c   : > { %1428 = vmatprep.subr.bf16.mxu0 %v1977_v23 }
 0x121   : > { %v2457_v30 = vpop.f32.mrb[0].mxu0 }
 0x122   : > { %v2459_v31 = vpop.f32.mrb[1].mxu0  ;;  %v503_v37 = vmax.f32 %v2457_v30, 0.0  ;;  %v2020_v30 = vld [vmem:[%s2744_s5 + $0xf0] ss:$8 sps:$4 sm:$0xff]  }
 0x123   : > { %v2461_v32 = vpop.f32.mrb[2].mxu0  ;;  %v504_v35 = vmax.f32 %v2459_v31, 0.0  ;;  %v2022_v31 = vld [vmem:[%s2744_s5 + $0xf4] ss:$8 sps:$4 sm:$0xff]  }
 0x124   : > { %v505_v33 = vmax.f32 %v2461_v32, 0.0  ;;  %v2464_v34 = vpop.f32.mrb[3].mxu0  ;;  %v2017_v32 = vld [vmem:[%s2744_s5 + $0xe0] ss:$8 sps:$4 sm:$0xff]  }
 0x125   : > { %v506_v36 = vmax.f32 %v2464_v34, 0.0 }
 0x126   : > { %v507_v39 = vpack.c.bf16 %v505_v33, %v503_v37 }
 0x127   : > { %v508_v38 = vpack.c.bf16 %v506_v36, %v504_v35 }
 0x129   : > { %733 = vmatprep.mubr.bf16.mxu1 %v508_v38  ;;  %v1989_v38 = vld [vmem:[%s2744_s5 + $0x44] ss:$8 sps:$4 sm:$0xff]  }
 0x12a   : > { %734 = vmatmul.mubr.bf16.vlgmr.msra.gmra.mrb[0].mxu1 %v507_v39  ;;  %v1987_v39 = vld [vmem:[%s2744_s5 + $0x40] ss:$8 sps:$4 sm:$0xff]  }
 0x12b   : > { %1188 = vmatpush1.bf16.msra.mxu1 %v1927_v44  ;;  %v1998_v44 = vld [vmem:[%s2744_s5 + $0x74] ss:$8 sps:$4 sm:$0xff]  }
 0x12c   : > { %1189 = vmatprep.subr.bf16.mxu1 %v1932_v46  ;;  %v2001_v46 = vld [vmem:[%s2744_s5 + $0x84] ss:$8 sps:$4 sm:$0xff]  }
 0x12f   : > { %1190 = vmatpush1.bf16.msra.mxu1 %v1930_v47  ;;  %v1999_v47 = vld [vmem:[%s2744_s5 + $0x80] ss:$8 sps:$4 sm:$0xff]  }
 0x130   : > { %1191 = vmatprep.subr.bf16.mxu1 %v1935_v48  ;;  %v2004_v48 = vld [vmem:[%s2744_s5 + $0x94] ss:$8 sps:$4 sm:$0xff]  }
 0x133   : > { %1192 = vmatpush1.bf16.msra.mxu1 %v1933_v49  ;;  %v2002_v49 = vld [vmem:[%s2744_s5 + $0x90] ss:$8 sps:$4 sm:$0xff]  }
 0x134   : > { %1193 = vmatprep.subr.bf16.mxu1 %v1938_v50  ;;  %v2007_v50 = vld [vmem:[%s2744_s5 + $0xa4] ss:$8 sps:$4 sm:$0xff]  }
 0x137   : > { %1194 = vmatpush1.bf16.msra.mxu1 %v1936_v51  ;;  %v2005_v51 = vld [vmem:[%s2744_s5 + $0xa0] ss:$8 sps:$4 sm:$0xff]  }
 0x138   : > { %1195 = vmatprep.subr.bf16.mxu1 %v1941_v52  ;;  %v2010_v52 = vld [vmem:[%s2744_s5 + $0xb4] ss:$8 sps:$4 sm:$0xff]  }
 0x13b   : > { %1196 = vmatpush1.bf16.msra.mxu1 %v1939_v53  ;;  %v2008_v53 = vld [vmem:[%s2744_s5 + $0xb0] ss:$8 sps:$4 sm:$0xff]  }
 0x13c   : > { %1197 = vmatprep.subr.bf16.mxu1 %v1944_v54  ;;  %v2013_v54 = vld [vmem:[%s2744_s5 + $0xc4] ss:$8 sps:$4 sm:$0xff]  }
 0x13f   : > { %1198 = vmatpush1.bf16.msra.mxu1 %v1942_v55  ;;  %v2011_v55 = vld [vmem:[%s2744_s5 + $0xc0] ss:$8 sps:$4 sm:$0xff]  }
 0x140   : > { %1199 = vmatprep.subr.bf16.mxu1 %v1947_v56  ;;  %v2016_v56 = vld [vmem:[%s2744_s5 + $0xd4] ss:$8 sps:$4 sm:$0xff]  }
 0x143   : > { %1200 = vmatpush1.bf16.msra.mxu1 %v1945_v57  ;;  %v2014_v57 = vld [vmem:[%s2744_s5 + $0xd0] ss:$8 sps:$4 sm:$0xff]  }
 0x144   : > { %1201 = vmatprep.subr.bf16.mxu1 %v1950_v58 }
 0x147   : > { %1202 = vmatpush1.bf16.msra.mxu1 %v1948_v59 }
 0x148   : > { %1203 = vmatprep.subr.bf16.mxu1 %v1953_v60 }
 0x14b   : > { %1204 = vmatpush1.bf16.msra.mxu1 %v1951_v61 }
 0x14c   : > { %1205 = vmatprep.subr.bf16.mxu1 %v1956_v62 }
 0x14f   : > { %1206 = vmatpush1.bf16.msra.mxu1 %v1954_v63 }
 0x150   : > { %1207 = vmatprep.subr.bf16.mxu1 %v1959_v0 }
 0x153   : > { %1208 = vmatpush1.bf16.msra.mxu1 %v1957_v1 }
 0x154   : > { %1209 = vmatprep.subr.bf16.mxu1 %v1962_v2 }
 0x157   : > { %1210 = vmatpush1.bf16.msra.mxu1 %v1960_v3 }
 0x158   : > { %1211 = vmatprep.subr.bf16.mxu1 %v1965_v4 }
 0x15b   : > { %1212 = vmatpush1.bf16.msra.mxu1 %v1963_v5 }
 0x15c   : > { %1213 = vmatprep.subr.bf16.mxu1 %v1968_v6 }
 0x15f   : > { %1214 = vmatpush1.bf16.msra.mxu1 %v1966_v7 }
 0x160   : > { %1215 = vmatprep.subr.bf16.mxu1 %v1971_v18 }
 0x163   : > { %1216 = vmatpush1.bf16.msra.mxu1 %v1969_v19 }
 0x164   : > { %1217 = vmatprep.subr.bf16.mxu1 %v1974_v20 }
 0x167   : > { %1218 = vmatpush1.bf16.msra.mxu1 %v1972_v21 }
 0x1fd   : > { %v735_v8 = vpop.f32.mrb[0].mxu1 }
 0x1fe   : > { %v737_v9 = vpop.f32.mrb[1].mxu1  ;;  %v744_v11 = vmax.f32 %v735_v8, 0.0  ;;  %v2019_v8 = vld [vmem:[%s2744_s5 + $0xe4] ss:$8 sps:$4 sm:$0xff]  }
 0x1ff   : > { %v739_v10 = vpop.f32.mrb[2].mxu1  ;;  %v745_v14 = vmax.f32 %v737_v9, 0.0 }
 0x200   : > { %v746_v12 = vmax.f32 %v739_v10, 0.0  ;;  %v741_v13 = vpop.f32.mrb[3].mxu1 }
 0x201   : > { %v747_v15 = vmax.f32 %v741_v13, 0.0 }
 0x202   : > { %v748_v16 = vpack.c.bf16 %v746_v12, %v744_v11 }
 0x203   : > { %v749_v17 = vpack.c.bf16 %v747_v15, %v745_v14 }
 0x205   : > { %974 = vmatprep.mubr.bf16.mxu0 %v749_v17 }
 0x206   : > { %975 = vmatmul.mubr.bf16.vlgmr.msra.gmra.mrb[4].mxu0 %v748_v16 }
 0x207   : > { %1429 = vmatpush1.bf16.msra.mxu0 %v1975_v22 }
 0x208   : > { %1430 = vmatprep.subr.bf16.mxu0 %v1980_v24 }
 0x20b   : > { %1431 = vmatpush1.bf16.msra.mxu0 %v1978_v25 }
 0x20c   : > { %1432 = vmatprep.subr.bf16.mxu0 %v1983_v26 }
 0x20f   : > { %1433 = vmatpush1.bf16.msra.mxu0 %v1981_v27 }
 0x210   : > { %1434 = vmatprep.subr.bf16.mxu0 %v1986_v28 }
 0x213   : > { %1435 = vmatpush1.bf16.msra.mxu0 %v1984_v29 }
 0x214   : > { %1436 = vmatprep.subr.bf16.mxu0 %v1989_v38 }
 0x217   : > { %1437 = vmatpush1.bf16.msra.mxu0 %v1987_v39 }
 0x218   : > { %1438 = vmatprep.subr.bf16.mxu0 %v1992_v40 }
 0x21b   : > { %1439 = vmatpush1.bf16.msra.mxu0 %v1990_v41 }
 0x21c   : > { %1440 = vmatprep.subr.bf16.mxu0 %v1995_v42 }
 0x21f   : > { %1441 = vmatpush1.bf16.msra.mxu0 %v1993_v43 }
 0x220   : > { %1442 = vmatprep.subr.bf16.mxu0 %v1998_v44 }
 0x223   : > { %1443 = vmatpush1.bf16.msra.mxu0 %v1996_v45 }
 0x224   : > { %1444 = vmatprep.subr.bf16.mxu0 %v2001_v46 }
 0x227   : > { %1445 = vmatpush1.bf16.msra.mxu0 %v1999_v47 }
 0x228   : > { %1446 = vmatprep.subr.bf16.mxu0 %v2004_v48 }
 0x22b   : > { %1447 = vmatpush1.bf16.msra.mxu0 %v2002_v49 }
 0x22c   : > { %1448 = vmatprep.subr.bf16.mxu0 %v2007_v50 }
 0x22f   : > { %1449 = vmatpush1.bf16.msra.mxu0 %v2005_v51 }
 0x230   : > { %1450 = vmatprep.subr.bf16.mxu0 %v2010_v52 }
 0x233   : > { %1451 = vmatpush1.bf16.msra.mxu0 %v2008_v53 }
 0x234   : > { %1452 = vmatprep.subr.bf16.mxu0 %v2013_v54 }
 0x237   : > { %1453 = vmatpush1.bf16.msra.mxu0 %v2011_v55 }
 0x238   : > { %1454 = vmatprep.subr.bf16.mxu0 %v2016_v56 }
 0x23b   : > { %1455 = vmatpush1.bf16.msra.mxu0 %v2014_v57 }
 0x23c   : > { %1456 = vmatprep.subr.bf16.mxu0 %v2019_v8 }
 0x23f   : > { %1457 = vmatpush1.bf16.msra.mxu0 %v2017_v32 }
 0x240   : > { %1458 = vmatprep.subr.bf16.mxu0 %v2022_v31 }
 0x243   : > { %1459 = vmatpush1.bf16.msra.mxu0 %v2020_v30 }
 0x2d9   : > { %v976_v58 = vpop.f32.mrb[4].mxu0 }
 0x2da   : > { %v978_v59 = vpop.f32.mrb[5].mxu0  ;;  %v985_v62 = vmax.f32 %v976_v58, 0.0 }
 0x2db   : > { %v986_v60 = vmax.f32 %v978_v59, 0.0  ;;  %v980_v61 = vpop.f32.mrb[6].mxu0 }
 0x2dc   : > { %v987_v63 = vmax.f32 %v980_v61, 0.0  ;;  %v982_v0 = vpop.f32.mrb[7].mxu0  ;;  %v989_v5 = vadd.f32 %v985_v62, %v503_v37 }
 0x2dd   : > { %v988_v1 = vmax.f32 %v982_v0, 0.0  ;;  %v990_v3 = vadd.f32 %v986_v60, %v504_v35 }
 0x2de   : > { %v991_v2 = vadd.f32 %v987_v63, %v505_v33 }
 0x2df   : > { %v992_v4 = vadd.f32 %v988_v1, %v506_v36 }
 0x2e0   : > { %v993_v7 = vpack.c.bf16 %v991_v2, %v989_v5 }
 0x2e1   : > { %v994_v6 = vpack.c.bf16 %v992_v4, %v990_v3 }
 0x2e3   : > { %1219 = vmatprep.mubr.bf16.mxu1 %v994_v6 }
 0x2e4   : > { %1220 = vmatmul.mubr.bf16.vlgmr.msra.gmra.mrb[4].mxu1 %v993_v7 }
 0x3b7   : > { %v1221_v33 = vpop.f32.mrb[4].mxu1 }
 0x3b8   : > { %v1223_v34 = vpop.f32.mrb[5].mxu1  ;;  %v1230_v36 = vmax.f32 %v1221_v33, 0.0 }
 0x3b9   : > { %v1225_v35 = vpop.f32.mrb[6].mxu1  ;;  %v1231_v10 = vmax.f32 %v1223_v34, 0.0 }
 0x3ba   : > { %v1232_v37 = vmax.f32 %v1225_v35, 0.0  ;;  %v1227_v9 = vpop.f32.mrb[7].mxu1 }
 0x3bb   : > { %v1233_v11 = vmax.f32 %v1227_v9, 0.0 }
 0x3bc   : > { %v1234_v12 = vpack.c.bf16 %v1232_v37, %v1230_v36 }
 0x3bd   : > { %v1235_v13 = vpack.c.bf16 %v1233_v11, %v1231_v10 }
 0x3bf   : > { %1460 = vmatprep.mubr.bf16.mxu0 %v1235_v13 }
 0x3c0   : > { %1461 = vmatmul.mubr.bf16.vlgmr.msra.gmra.mrb[8].mxu0 %v1234_v12 }
 0x493   : > { %v1462_v14 = vpop.f32.mrb[8].mxu0 }
 0x494   : > { %v1471_v15 = vmax.f32 %v1462_v14, 0.0  ;;  %v1464_v16 = vpop.f32.mrb[9].mxu0 }
 0x495   : > { %v1472_v17 = vmax.f32 %v1464_v16, 0.0  ;;  %v1466_v18 = vpop.f32.mrb[10].mxu0 }
 0x496   : > { %v1475_v19 = vadd.f32 %v1471_v15, %v989_v5  ;;  %v1473_v20 = vmax.f32 %v1466_v18, 0.0  ;;  %v1468_v21 = vpop.f32.mrb[11].mxu0 }
 0x497   : > { %v1476_v22 = vadd.f32 %v1472_v17, %v990_v3  ;;  %v1474_v23 = vmax.f32 %v1468_v21, 0.0 }
 0x498   : > { %1479 = vst [vmem:[%s247_s19] sm:$0xff] %v1475_v19  ;;  %v1477_v24 = vadd.f32 %v1473_v20, %v991_v2 }
 0x499   : > { %1480 = vst [vmem:[%s247_s19 + $0x8] sm:$0xff] %v1476_v22  ;;  %v1478_v25 = vadd.f32 %v1474_v23, %v992_v4 }
 0x49a   : > { %1481 = vst [vmem:[%s247_s19 + $0x10] sm:$0xff] %v1477_v24 }
 0x49b   : > { %1482 = vst [vmem:[%s247_s19 + $0x18] sm:$0xff] %v1478_v25 }
 0x49c   : > { %2036 = shalt.err (!%p2033_p3)
}
 0x49d   : > { %s2037_s28 = scalar_lea.hbm %s2696_s16, 512  ;;  %s2041_s11 = scalar_lea.hbm %s2745_s6, 1024 }
 0x49e   : > { %p2038_p4 = scmp.ne.s32.totalorder %s2696_s16, %s2037_s28  ;;  %p2042_p9 = scmp.lt.u32.totalorder %s2696_s16, %s2745_s6 }
 0x49f   : > { %p2043_p10 = scmp.lt.u32.totalorder %s2041_s11, %s2037_s28  ;;  %p2045_p12 = scmp.lt.u32.totalorder %s2037_s28, %s2696_s16 }
 0x4a0   : > { %p2039_p7 = pnand %p2038_p4, %p2163_p5 }
 0x4a1   : > { %p2044_p11 = por %p2043_p10, %p2042_p9 }
 0x4a2   : > { %p2040_p8 = pneg %p2039_p7 }
 0x4a3   : > { %p2046_p13 = por %p2045_p12, %p2044_p11 }
 0x4a5   : > { %p2047_p0 = pnand %p2046_p13, %p2040_p8 }
 0x4a7   : > { %2050 = shalt.err (!%p2047_p0)
}
 0x4a8   : > { %s2088_s29 = smov 256   ;;  %s2089_s14 = smov 16  }
 0x4a9   : > { %1739 = dma.vmem_to_hbm [thread:$0]  (%p2163_p5), %s2691_s13, 512, %s2696_s16, %s2698_s25, %s2088_s29, %s2088_s29, %s2089_s14  }
 0x4aa PF: > { %p1745_p1 = scmp.ge.s32.totalorder %s2085_s24, 2  ;;  %s1513_s15 = sand.u32 1, %s2073_s21  }
 0x4ab   : > { %s1514_s17 = scalar_lea.sflag [#allocation3], %s1513_s15 }
 0x4ac   : > { %p1742_p2 = pnand %p1745_p1, %p2167_p6 }
 0x4ae   : > { %2068 = dma.done.wait (!%p1742_p2), %s1514_s17, 512  }
 0x4af   : > { %2070 = vsyncadd (!%p1742_p2), %s1514_s17, 4294966784  ;;  %p16_p3 = scmp.ge.s32.totalorder %s2150_s27, 4   ;;  %s2748_s21 = smov %s2077_s22 }
 0x4b0   : > { %s2749_s22 = smov %s2081_s23  ;;  %s2750_s23 = smov %s2161_s30 }
 0x4b1   : > { %s2751_s24 = smov %s2150_s27  ;;  %18 = sbr.rel (!%p16_p3) target bundleno = 3 (0x3), region = 79 }
 0x4b8   :  { %1519 = vsyncpa [#allocation3], 1 }
 0x4b9   :  { %1521 = vsyncpa [#allocation3 + $0x1], 1 }

</bundles_post_ra>
